<compile_context>
chip_gen: v5e
topology: v5e:2x2
jax: 0.10.0
libtpu: 0.0.40
codegen_flags: <defaults>
</compile_context>

<pallas_src>
import math

import jax
import jax.numpy as jnp
from jax.experimental import pallas as pl
from jax.experimental.pallas import tpu as pltpu

SUBLANE = 8  # second-to-last-dim tiling of a vreg


def _round_up(n, m):
    return ((n + m - 1) // m) * m


def _mlp_kernel(x_ref, w1_ref, b1_ref, w2_ref, b2_ref, w3_ref, b3_ref, o_ref):
    # Fused 3-layer MLP hot path: three MXU matmuls with f32 accumulation plus
    # VPU bias-add/ReLU, everything resident in VMEM for this batch tile.
    # Activations are cast to the weight dtype (f32 default, bf16 optional);
    # biases stay f32 and are added to the f32 accumulator.
    cdt = w1_ref.dtype
    h = jnp.dot(x_ref[...].astype(cdt), w1_ref[...],
                preferred_element_type=jnp.float32) + b1_ref[...]
    h = jnp.maximum(h, 0.0)
    h = jnp.dot(h.astype(cdt), w2_ref[...],
                preferred_element_type=jnp.float32) + b2_ref[...]
    h = jnp.maximum(h, 0.0)
    h = jnp.dot(h.astype(cdt), w3_ref[...],
                preferred_element_type=jnp.float32) + b3_ref[...]
    o_ref[...] = jnp.maximum(h, 0.0)


def prepare_params(params, *, use_bf16=False):
    """One-time parameter prep (hoisted out of the per-forward path).

    use_bf16=True casts weights to bf16 once (halves weight DMA / VMEM and
    avoids multi-pass f32 MXU on v5e); accumulation stays f32.  Note: bf16
    weights will not satisfy a 1e-5 allclose check against an f32 reference.
    """
    if not use_bf16:
        return params
    out = dict(params)
    for k in ("w1", "w2", "w3"):
        out[k] = params[k].astype(jnp.bfloat16)
    return out


def deep_kernel_network(x, params, *, tm=None):
    """Forward pass of DeepKernelNetwork.

    x:      (B, input_dim) float32
    params: dict with w1 (in,h), b1 (1,h), w2 (h,h), b2 (1,h), w3 (h,h), b3 (1,h)
            (optionally pre-processed by prepare_params)
    returns (B, hidden) float32
    """
    B, input_dim = x.shape
    hidden = params["w1"].shape[1]
    assert params["w1"].shape[0] == input_dim

    # Batch tile: big enough to amortize ~0.35 us/grid-step pipeline overhead,
    # but split into >=2 tiles whenever possible so a "parallel" grid can feed
    # both v7x TensorCores (v5e/v6e have 1 TC and are unaffected).
    if tm is None:
        tm = min(2048, _round_up(pl.cdiv(B, 2), SUBLANE))
    tm = max(SUBLANE, _round_up(tm, SUBLANE))

    # cdiv grid: no batch padding; Pallas clips the partial last tile.  Rows
    # beyond B are never consumed (no cross-row reduction) and only in-bounds
    # output rows are written back.
    grid = (pl.cdiv(B, tm),)

    # Full-array blocks for the (tiny, resident) weights/biases.
    weight_spec = lambda shape: pl.BlockSpec(shape, lambda i: (0, 0))

    # NOTE: jnp.dot uses JAX's default TPU matmul precision; K,N <= 32 here so
    # the deviation from full-f32 passes is far below the 1e-5 check tolerance.
    out = pl.pallas_call(
        _mlp_kernel,
        out_shape=jax.ShapeDtypeStruct((B, hidden), jnp.float32),
        grid_spec=pltpu.PrefetchScalarGridSpec(
            num_scalar_prefetch=0,
            grid=grid,
            in_specs=[
                # x tile: last dim == full array dim (exempt from 128 rule).
                pl.BlockSpec((tm, input_dim), lambda i: (i, 0)),
                weight_spec((input_dim, hidden)),   # w1
                weight_spec((1, hidden)),           # b1
                weight_spec((hidden, hidden)),      # w2
                weight_spec((1, hidden)),           # b2
                weight_spec((hidden, hidden)),      # w3
                weight_spec((1, hidden)),           # b3
            ],
            # Compact output: (tm, hidden) blocks, no post-kernel slice needed.
            out_specs=pl.BlockSpec((tm, hidden), lambda i: (i, 0)),
        ),
        compiler_params=pltpu.CompilerParams(
            dimension_semantics=("parallel",),
            vmem_limit_bytes=32 << 20,  # headroom for tm up to 2048 on v5e
        ),
    )(x, params["w1"], params["b1"], params["w2"], params["b2"],
      params["w3"], params["b3"])

    return out


def init_params(key, input_dim, hidden_dim=32):
    """Deterministic init mimicking PyTorch nn.Linear (uniform +/- 1/sqrt(fan_in))."""
    keys = jax.random.split(key, 6)

    def linear(kw, kb, fan_in, fan_out):
        bound = 1.0 / math.sqrt(fan_in)
        w = jax.random.uniform(kw, (fan_in, fan_out), jnp.float32, -bound, bound)
        b = jax.random.uniform(kb, (1, fan_out), jnp.float32, -bound, bound)
        return w, b

    w1, b1 = linear(keys[0], keys[1], input_dim, hidden_dim)
    w2, b2 = linear(keys[2], keys[3], hidden_dim, hidden_dim)
    w3, b3 = linear(keys[4], keys[5], hidden_dim, hidden_dim)
    return {"w1": w1, "b1": b1, "w2": w2, "b2": b2, "w3": w3, "b3": b3}


def deep_kernel_network_ref(x, p):
    h = jnp.maximum(x @ p["w1"] + p["b1"], 0.0)
    h = jnp.maximum(h @ p["w2"] + p["b2"], 0.0)
    h = jnp.maximum(h @ p["w3"] + p["b3"], 0.0)
    return h


if __name__ == "__main__":
    key = jax.random.PRNGKey(0)
    k_param, k_x1, k_x2 = jax.random.split(key, 3)

    input_dim, hidden_dim = 16, 32
    params = prepare_params(init_params(k_param, input_dim, hidden_dim))

    # Small shape consistent with the module (single batch tile).
    batch = 8
    x = jax.random.normal(k_x1, (batch, input_dim), jnp.float32)
    out = jax.block_until_ready(deep_kernel_network(x, params))
    ref = deep_kernel_network_ref(x, params)
    assert out.shape == (batch, hidden_dim)
    assert jnp.allclose(out, ref, atol=1e-5, rtol=1e-5)

    # Ragged, multi-tile batch (exercises the cdiv grid + clipped last tile).
    batch2 = 530
    x2 = jax.random.normal(k_x2, (batch2, input_dim), jnp.float32)
    out2 = jax.block_until_ready(deep_kernel_network(x2, params))
    ref2 = deep_kernel_network_ref(x2, params)
    assert out2.shape == (batch2, hidden_dim)
    assert jnp.allclose(out2, ref2, atol=1e-5, rtol=1e-5)

    print("KERNEL_OK")
</pallas_src>

<mosaic_0001>
module attributes {stable_mosaic.version = 11 : i64} {
  func.func @_mlp_kernel(%arg0: i32, %arg1: memref<8x16xf32, #tpu.memory_space<vmem>>, %arg2: memref<16x32xf32, #tpu.memory_space<vmem>>, %arg3: memref<1x32xf32, #tpu.memory_space<vmem>>, %arg4: memref<32x32xf32, #tpu.memory_space<vmem>>, %arg5: memref<1x32xf32, #tpu.memory_space<vmem>>, %arg6: memref<32x32xf32, #tpu.memory_space<vmem>>, %arg7: memref<1x32xf32, #tpu.memory_space<vmem>>, %arg8: memref<8x32xf32, #tpu.memory_space<vmem>>) attributes {dimension_semantics = [#tpu.dimension_semantics<parallel>], iteration_bounds = array<i64: 1>, scalar_prefetch = 0 : i64, scratch_operands = 0 : i64, tpu.core_type = #tpu.core_type<tc>, window_params = [{transform_indices = @transform_0, window_bounds = array<i64: 8, 16>}, {pipeline_mode = #tpu.pipeline_mode<synchronous>, transform_indices = @transform_1, window_bounds = array<i64: 16, 32>}, {pipeline_mode = #tpu.pipeline_mode<synchronous>, transform_indices = @transform_2, window_bounds = array<i64: 1, 32>}, {pipeline_mode = #tpu.pipeline_mode<synchronous>, transform_indices = @transform_3, window_bounds = array<i64: 32, 32>}, {pipeline_mode = #tpu.pipeline_mode<synchronous>, transform_indices = @transform_4, window_bounds = array<i64: 1, 32>}, {pipeline_mode = #tpu.pipeline_mode<synchronous>, transform_indices = @transform_5, window_bounds = array<i64: 32, 32>}, {pipeline_mode = #tpu.pipeline_mode<synchronous>, transform_indices = @transform_6, window_bounds = array<i64: 1, 32>}, {transform_indices = @transform_7, window_bounds = array<i64: 8, 32>}]} {
    %c0 = arith.constant 0 : index
    %c0_0 = arith.constant 0 : index
    %0 = vector.load %arg1[%c0, %c0_0] : memref<8x16xf32, #tpu.memory_space<vmem>>, vector<8x16xf32>
    %c0_1 = arith.constant 0 : index
    %c0_2 = arith.constant 0 : index
    %1 = vector.load %arg2[%c0_1, %c0_2] : memref<16x32xf32, #tpu.memory_space<vmem>>, vector<16x32xf32>
    %cst = arith.constant dense<0.000000e+00> : vector<8x32xf32>
    %2 = tpu.matmul %0, %1, %cst {dimension_numbers = #tpu.dot_dimension_numbers<[1], [0], [0], [1], [0, 0, 1, 1], [], []>} : vector<8x16xf32>, vector<16x32xf32>, vector<8x32xf32> -> vector<8x32xf32>
    %c0_3 = arith.constant 0 : index
    %c0_4 = arith.constant 0 : index
    %3 = vector.load %arg3[%c0_3, %c0_4] : memref<1x32xf32, #tpu.memory_space<vmem>>, vector<1x32xf32>
    %4 = vector.broadcast %3 : vector<1x32xf32> to vector<8x32xf32>
    %5 = arith.addf %2, %4 : vector<8x32xf32>
    %cst_5 = arith.constant 0.000000e+00 : f32
    %6 = vector.broadcast %cst_5 : f32 to vector<8x32xf32>
    %7 = arith.maximumf %5, %6 : vector<8x32xf32>
    %c0_6 = arith.constant 0 : index
    %c0_7 = arith.constant 0 : index
    %8 = vector.load %arg4[%c0_6, %c0_7] : memref<32x32xf32, #tpu.memory_space<vmem>>, vector<32x32xf32>
    %cst_8 = arith.constant dense<0.000000e+00> : vector<8x32xf32>
    %9 = tpu.matmul %7, %8, %cst_8 {dimension_numbers = #tpu.dot_dimension_numbers<[1], [0], [0], [1], [0, 0, 1, 1], [], []>} : vector<8x32xf32>, vector<32x32xf32>, vector<8x32xf32> -> vector<8x32xf32>
    %c0_9 = arith.constant 0 : index
    %c0_10 = arith.constant 0 : index
    %10 = vector.load %arg5[%c0_9, %c0_10] : memref<1x32xf32, #tpu.memory_space<vmem>>, vector<1x32xf32>
    %11 = vector.broadcast %10 : vector<1x32xf32> to vector<8x32xf32>
    %12 = arith.addf %9, %11 : vector<8x32xf32>
    %cst_11 = arith.constant 0.000000e+00 : f32
    %13 = vector.broadcast %cst_11 : f32 to vector<8x32xf32>
    %14 = arith.maximumf %12, %13 : vector<8x32xf32>
    %c0_12 = arith.constant 0 : index
    %c0_13 = arith.constant 0 : index
    %15 = vector.load %arg6[%c0_12, %c0_13] : memref<32x32xf32, #tpu.memory_space<vmem>>, vector<32x32xf32>
    %cst_14 = arith.constant dense<0.000000e+00> : vector<8x32xf32>
    %16 = tpu.matmul %14, %15, %cst_14 {dimension_numbers = #tpu.dot_dimension_numbers<[1], [0], [0], [1], [0, 0, 1, 1], [], []>} : vector<8x32xf32>, vector<32x32xf32>, vector<8x32xf32> -> vector<8x32xf32>
    %c0_15 = arith.constant 0 : index
    %c0_16 = arith.constant 0 : index
    %17 = vector.load %arg7[%c0_15, %c0_16] : memref<1x32xf32, #tpu.memory_space<vmem>>, vector<1x32xf32>
    %18 = vector.broadcast %17 : vector<1x32xf32> to vector<8x32xf32>
    %19 = arith.addf %16, %18 : vector<8x32xf32>
    %cst_17 = arith.constant 0.000000e+00 : f32
    %20 = vector.broadcast %cst_17 : f32 to vector<8x32xf32>
    %21 = arith.maximumf %19, %20 : vector<8x32xf32>
    %c0_18 = arith.constant 0 : index
    %c0_19 = arith.constant 0 : index
    %22 = vector.load %arg8[%c0_18, %c0_19] : memref<8x32xf32, #tpu.memory_space<vmem>>, vector<8x32xf32>
    tpu.vector_store %arg8[%c0_18, %c0_19], %21 {strides = array<i32>} : memref<8x32xf32, #tpu.memory_space<vmem>>, vector<8x32xf32>,
    return
  }
  func.func @transform_0(%arg0: i32) -> (i32, i32) {
    %c0_i32 = arith.constant 0 : i32
    %c0_i32_0 = arith.constant 0 : i32
    return %arg0, %c0_i32 : i32, i32
  }
  func.func @transform_1(%arg0: i32) -> (i32, i32) {
    %c0_i32 = arith.constant 0 : i32
    %c0_i32_0 = arith.constant 0 : i32
    %c0_i32_1 = arith.constant 0 : i32
    return %c0_i32, %c0_i32_0 : i32, i32
  }
  func.func @transform_2(%arg0: i32) -> (i32, i32) {
    %c0_i32 = arith.constant 0 : i32
    %c0_i32_0 = arith.constant 0 : i32
    %c0_i32_1 = arith.constant 0 : i32
    return %c0_i32, %c0_i32_0 : i32, i32
  }
  func.func @transform_3(%arg0: i32) -> (i32, i32) {
    %c0_i32 = arith.constant 0 : i32
    %c0_i32_0 = arith.constant 0 : i32
    %c0_i32_1 = arith.constant 0 : i32
    return %c0_i32, %c0_i32_0 : i32, i32
  }
  func.func @transform_4(%arg0: i32) -> (i32, i32) {
    %c0_i32 = arith.constant 0 : i32
    %c0_i32_0 = arith.constant 0 : i32
    %c0_i32_1 = arith.constant 0 : i32
    return %c0_i32, %c0_i32_0 : i32, i32
  }
  func.func @transform_5(%arg0: i32) -> (i32, i32) {
    %c0_i32 = arith.constant 0 : i32
    %c0_i32_0 = arith.constant 0 : i32
    %c0_i32_1 = arith.constant 0 : i32
    return %c0_i32, %c0_i32_0 : i32, i32
  }
  func.func @transform_6(%arg0: i32) -> (i32, i32) {
    %c0_i32 = arith.constant 0 : i32
    %c0_i32_0 = arith.constant 0 : i32
    %c0_i32_1 = arith.constant 0 : i32
    return %c0_i32, %c0_i32_0 : i32, i32
  }
  func.func @transform_7(%arg0: i32) -> (i32, i32) {
    %c0_i32 = arith.constant 0 : i32
    %c0_i32_0 = arith.constant 0 : i32
    return %arg0, %c0_i32 : i32, i32
  }
}

</mosaic_0001>

<bundles_post_ra>
// kernel: tpu_custom_call.1
= control target key start
LH: loop header
LB: loop body
LE: loop exit
PB: predicated region body
PF: predicated region fallthrough
CT: control target
= control target key end

     0   :  { %12 = vsyncpa [#allocation3], 0  ;;  %s420_s0 = inlined_call_operand.hbm [shape: f32[8,16], index: 0, kind: input, shape index: {}]   ;;  %s421_s1 = inlined_call_operand.hbm [shape: f32[16,32], index: 1, kind: input, shape index: {}]   ;;  %s422_s2 = inlined_call_operand.vmem [shape: f32[1,32], index: 2, kind: input, shape index: {}]   ;;  %s423_s3 = inlined_call_operand.hbm [shape: f32[32,32], index: 3, kind: input, shape index: {}]   ;;  %s424_s4 = inlined_call_operand.vmem [shape: f32[1,32], index: 4, kind: input, shape index: {}]   ;;  %s425_s5 = inlined_call_operand.hbm [shape: f32[32,32], index: 5, kind: input, shape index: {}]   ;;  %s426_s6 = inlined_call_operand.vmem [shape: f32[1,32], index: 6, kind: input, shape index: {}]   ;;  %s427_s7 = inlined_call_operand.hbm [shape: f32[8,32], index: 7, kind: output, shape index: {}]  }
   0x1   :  { %13 = vsyncpa [#allocation6], 0 }
   0x2   :  { %14 = vsyncpa [#allocation9], 0  ;;  %s31_s26 = sshll.u32 %s421_s1, 4  ;;  %s32_s26 = int_to_ptr.hbm [resolvable:$true] %s31_s26 }
   0x3   :  { %15 = vsyncpa [#allocation4], 0  ;;  %s346_s27 = smov [#allocation5]   ;;  %s21_s8 = sshll.u32 %s420_s0, 4  ;;  %s22_s8 = int_to_ptr.hbm [resolvable:$true] %s21_s8 }
   0x4   :  { %s33_s28 = sshll.u32 %s346_s27, 4  ;;  %s347_s9 = smov 128   ;;  %s34_s28 = int_to_ptr.vmem [resolvable:$true] %s33_s28 }
   0x5   :  { %s348_s10 = smov 8   ;;  %s349_s11 = smov [#allocation2]  }
   0x6   :  { %39 = dma.hbm_to_vmem [thread:$0]  %s32_s26, 256, %s34_s28, [#allocation6], %s347_s9, %s347_s9, %s348_s10  }
   0x7   :  { %s23_s12 = sshll.u32 %s349_s11, 4  ;;  %s46_s15 = sshll.u32 %s423_s3, 4  ;;  %s24_s12 = int_to_ptr.vmem [resolvable:$true] %s23_s12  ;;  %s47_s15 = int_to_ptr.hbm [resolvable:$true] %s46_s15 }
   0x8   :  { %26 = dma.hbm_to_vmem [thread:$0]  %s22_s8, 128, %s24_s12, [#allocation3]  }
   0x9   :  { %s61_s17 = sshll.u32 %s425_s5, 4  ;;  %s350_s18 = smov [#allocation7]   ;;  %s62_s17 = int_to_ptr.hbm [resolvable:$true] %s61_s17 }
   0xa   :  { %s48_s19 = sshll.u32 %s350_s18, 4  ;;  %s351_s0 = smov [#allocation8]   ;;  %s49_s19 = int_to_ptr.vmem [resolvable:$true] %s48_s19 }
   0xb   :  { %54 = dma.hbm_to_vmem [thread:$0]  %s47_s15, 512, %s49_s19, [#allocation6], %s347_s9, %s347_s9, %s348_s10  }
   0xc   :  { %s63_s20 = sshll.u32 %s351_s0, 4  ;;  %s64_s20 = int_to_ptr.vmem [resolvable:$true] %s63_s20 }
   0xd   :  { %69 = dma.hbm_to_vmem [thread:$0]  %s62_s17, 512, %s64_s20, [#allocation9], %s347_s9, %s347_s9, %s348_s10  }
   0xe   :  { %338 = dma.done.wait [#allocation3], 128  }
   0xf   :  { %339 = vsyncadd [#allocation3], 4294967168 }
  0x10   :  { %340 = dma.done.wait [#allocation6], 768  }
  0x11   :  { %341 = vsyncadd [#allocation6], 4294966528 }
  0x12   :  { %342 = dma.done.wait [#allocation9], 512  }
  0x13   :  { %343 = vsyncadd [#allocation9], 4294966784  ;;  %v90_v0 = vld [vmem:[#allocation5 + $0x8] sm:$0xff]  ;;  %v89_v1 = vld [vmem:[#allocation5] sm:$0xff]  ;;  %vm95_vm0 = vcmask 130048   ;;  %vm128_vm1 = vcmask 261120  }
  0x14   :  { %113 = vmatpush.msra.mxu0 %v90_v0  ;;  %v88_v2 = vld [vmem:[#allocation2] sm:$0xff]  ;;  %v123_v3 = vld [vmem:[#allocation7 + $0x18] sm:$0xff]  ;;  %v122_v4 = vld [vmem:[#allocation7 + $0x10] sm:$0xff]  ;;  %s352_s24 = smov [#allocation10]   ;;  %s193_s28 = sshll.u32 %s427_s7, 4  ;;  %s194_s28 = int_to_ptr.hbm [resolvable:$true] %s193_s28 }
  0x15   :  { %144 = vmatpush.msra.mxu1 %v123_v3  ;;  %v121_v5 = vld [vmem:[#allocation7 + $0x8] sm:$0xff]  ;;  %v120_v6 = vld [vmem:[#allocation7] sm:$0xff]  ;;  %v156_v7 = vld [vmem:[#allocation8 + $0x18] sm:$0xff]  ;;  %s191_s25 = sshll.u32 %s352_s24, 4  ;;  %s192_s25 = int_to_ptr.vmem [resolvable:$true] %s191_s25 }
  0x16   :  { %114 = vmatpush.msra.mxu0 %v89_v1  ;;  %176 = vmatpush.msra.mxu2 %v156_v7  ;;  %v215_v8 = vld [vmem:[%s422_s2] ss:$0 sm:$0xff]  ;;  %v155_v12 = vld [vmem:[#allocation8 + $0x10] sm:$0xff]  ;;  %v153_v14 = vld [vmem:[#allocation8] sm:$0xff] }
  0x17   :  { %205 = vmatmul.msk.f32.vlgmr.msra.gmra.mxu0 %vm95_vm0, %v88_v2  ;;  %145 = vmatpush.msra.mxu1 %v122_v4  ;;  %v154_v13 = vld [vmem:[#allocation8 + $0x8] sm:$0xff] }
  0x18   :  { %177 = vmatpush.msra.mxu2 %v155_v12  ;;  %v216_v15 = vld [vmem:[%s424_s4] ss:$0 sm:$0xff] }
  0x19   :  { %146 = vmatpush.msra.mxu1 %v121_v5  ;;  %v217_v19 = vld [vmem:[%s426_s6] ss:$0 sm:$0xff] }
  0x1a   :  { %178 = vmatpush.msra.mxu2 %v154_v13 }
  0x1b   :  { %147 = vmatpush.msra.mxu1 %v120_v6 }
  0x1c   :  { %179 = vmatpush.msra.mxu2 %v153_v14 }
  0x94   :  { %v116_v9 = vpop.f32.mrf.mxu0 }
  0x95   :  { %v117_v10 = vadd.f32 %v215_v8, %v116_v9 }
  0x97   :  { %v119_v11 = vmax.f32 %v117_v10, 0.0 }
  0x99   :  { %206 = vmatmul.msk.f32.vlgmr.msra.gmra.mxu1 %vm128_vm1, %v119_v11 }
 0x116   :  { %v149_v16 = vpop.f32.mrf.mxu1 }
 0x117   :  { %v150_v17 = vadd.f32 %v216_v15, %v149_v16 }
 0x119   :  { %v152_v18 = vmax.f32 %v150_v17, 0.0 }
 0x11b   :  { %207 = vmatmul.msk.f32.vlgmr.msra.gmra.mxu2 %vm128_vm1, %v152_v18 }
 0x19e   :  { %v181_v20 = vpop.f32.mrf.mxu2 }
 0x19f   :  { %v182_v21 = vadd.f32 %v217_v19, %v181_v20 }
 0x1a1   :  { %v184_v22 = vmax.f32 %v182_v21, 0.0 }
 0x1a3   :  { %185 = vst.msk [vmem:[#allocation10] sm:$0xff] %vm128_vm1, %v184_v22 }
 0x1a4   :  { %196 = dma.vmem_to_hbm [thread:$0]  %s192_s25, 128, %s194_s28, [#allocation4]  }
 0x1a5   :  { %344 = dma.done.wait [#allocation4], 128  }
 0x1a6   :  { %345 = vsyncadd [#allocation4], 4294967168 }
 0x1a7   :  { %201 = vsyncpa [#allocation3], 1 }
 0x1a8   :  { %202 = vsyncpa [#allocation6], 1 }
 0x1a9   :  { %203 = vsyncpa [#allocation9], 1 }
 0x1aa   :  { %204 = vsyncpa [#allocation4], 1 }

</bundles_post_ra>
